<compile_context>
chip_gen: v5e
topology: v5e:2x2
jax: 0.10.0
libtpu: 0.0.40
codegen_flags: <defaults>
</compile_context>

<pallas_src>
import jax
import jax.numpy as jnp
from jax.experimental import pallas as pl
from jax.experimental.pallas import tpu as pltpu

HIDDEN = 32                                   # hidden_size
OUTPUT = 64                                   # output_size (vocab)
GATE_PAD = ((3 * HIDDEN + 127) // 128) * 128  # 96 -> 128 lanes
OUT_PAD = ((OUTPUT + 127) // 128) * 128       # 64 -> 128 lanes


def decoder_seq_kernel(tok_ref, h0_ref, emb_ref, wih_ref, whh_ref,
                       bih_ref, bhh_ref, wout_ref, bout_ref,
                       logp_ref, hout_ref,
                       x_scratch, gi_scratch, h_scratch):
    T = logp_ref.shape[0]
    H = HIDDEN
    unroll = True if T <= 16 else 8

    # ---- Phase 1 (off the recurrence): gather embeddings, relu, fused
    #      input-side gate matmul for ALL steps at once. ----------------------
    def gather(t, carry):
        # token ids live in SMEM; (1, H) row gather via dynamic sublane slice.
        x_scratch[pl.ds(t, 1), :] = emb_ref[pl.ds(tok_ref[t], 1), :]
        return carry
    jax.lax.fori_loop(0, T, gather, 0, unroll=unroll)

    x = jnp.maximum(x_scratch[...], 0.0)                           # relu(emb), (T, H)
    # GI = relu(X) @ [W_ir|W_iz|W_in]^T + (b_ih + b_hh_rz folded in), (T, 128)
    gi_scratch[...] = (jnp.dot(x, wih_ref[...], preferred_element_type=jnp.float32)
                       + bih_ref[...])

    whh = whh_ref[...]        # (H, 128)  resident
    bhh = bhh_ref[...]        # (1, 128)  only the n-lanes are nonzero

    # ---- Phase 2: serial GRU recurrence (one M=1 matmul + gate math per step) ----
    def step(t, h):
        gi = gi_scratch[pl.ds(t, 1), :]                                   # (1, 128)
        gh = jnp.dot(h, whh, preferred_element_type=jnp.float32) + bhh    # (1, 128)
        rz = jax.nn.sigmoid(gi[:, :2 * H] + gh[:, :2 * H])
        r = rz[:, :H]
        z = rz[:, H:2 * H]
        n = jnp.tanh(gi[:, 2 * H:3 * H] + r * gh[:, 2 * H:3 * H])
        h_new = (1.0 - z) * n + z * h                                     # (1, H)
        h_scratch[pl.ds(t, 1), :] = h_new
        return h_new

    h_final = jax.lax.fori_loop(0, T, step, h0_ref[...], unroll=unroll)
    hout_ref[...] = h_final

    # ---- Phase 3 (off the recurrence): output projection + batched log_softmax ----
    hs = h_scratch[...]                                                   # (T, H)
    logits = (jnp.dot(hs, wout_ref[...], preferred_element_type=jnp.float32)
              + bout_ref[...])                                            # (T, 128)
    # b_out pad lanes hold -1e30 and w_out pad lanes are zero, so pad logits are
    # ~-1e30: exp underflows to 0 and the normalizer only sees the valid lanes.
    m = jnp.max(logits, axis=-1, keepdims=True)
    s = logits - m
    lse = jnp.log(jnp.sum(jnp.exp(s), axis=-1, keepdims=True))
    logp_ref[...] = s - lse                                               # lane-dense store


def decoder_decode(tokens, hidden, params):
    """tokens: int32 (T,); hidden: f32 (1,1,H).
    Applies the DecoderRNN forward step T times (hidden carried through).
    Returns (log_probs (T, OUTPUT), hidden (1, 1, H))."""
    T = tokens.shape[0]
    h0 = hidden.reshape(1, HIDDEN).astype(jnp.float32)

    smem = pl.BlockSpec(memory_space=pltpu.MemorySpace.SMEM)
    vmem = pl.BlockSpec(memory_space=pltpu.MemorySpace.VMEM)
    logp_pad, h_new = pl.pallas_call(
        decoder_seq_kernel,
        out_shape=(jax.ShapeDtypeStruct((T, OUT_PAD), jnp.float32),
                   jax.ShapeDtypeStruct((1, HIDDEN), jnp.float32)),
        in_specs=[smem] + [vmem] * 8,
        out_specs=(vmem, vmem),
        scratch_shapes=[pltpu.VMEM((T, HIDDEN), jnp.float32),     # gathered embeddings
                        pltpu.VMEM((T, GATE_PAD), jnp.float32),   # precomputed GI
                        pltpu.VMEM((T, HIDDEN), jnp.float32)],    # per-step hidden states
    )(tokens.astype(jnp.int32), h0, params["embedding"], params["w_ih"],
      params["w_hh"], params["b_ih"], params["b_hh"], params["w_out"],
      params["b_out"])
    return logp_pad[:, :OUTPUT], h_new.reshape(1, 1, HIDDEN)


def decoder_forward(token, hidden, params):
    """Single-step forward matching the PyTorch module signature.
    token: int32 (1, 1); hidden: f32 (1, 1, H)."""
    logp, h_new = decoder_decode(token.reshape(1), hidden, params)
    return logp, h_new


def _pad_lanes(a, n):
    pad = n - a.shape[-1]
    return jnp.pad(a, [(0, 0)] * (a.ndim - 1) + [(0, pad)])


def init_params(key, hidden_size=HIDDEN, output_size=OUTPUT):
    ks = jax.random.split(key, 7)
    H = hidden_size
    bound = 1.0 / jnp.sqrt(float(H))
    emb = jax.random.normal(ks[0], (output_size, H), jnp.float32)
    # PyTorch GRU stores weight_ih/weight_hh as (3H, H), gate order (r, z, n).
    w_ih_pt = jax.random.uniform(ks[1], (3 * H, H), jnp.float32, -bound, bound)
    w_hh_pt = jax.random.uniform(ks[2], (3 * H, H), jnp.float32, -bound, bound)
    b_ih_pt = jax.random.uniform(ks[3], (3 * H,), jnp.float32, -bound, bound)
    b_hh_pt = jax.random.uniform(ks[4], (3 * H,), jnp.float32, -bound, bound)
    w_out_pt = jax.random.uniform(ks[5], (output_size, H), jnp.float32, -bound, bound)
    b_out_pt = jax.random.uniform(ks[6], (output_size,), jnp.float32, -bound, bound)

    # Fold the r/z lanes of b_hh into b_ih (sigmoid sees gi+gh, so it's exact);
    # keep only the n lanes of b_hh for the per-step gh bias (needed inside r*gh_n).
    b_ih_eff = b_ih_pt.at[:2 * H].add(b_hh_pt[:2 * H])
    b_hh_eff = b_hh_pt.at[:2 * H].set(0.0)

    # Bake the pad-lane mask into b_out: pad lanes -> -1e30 (w_out pad lanes are 0,
    # so padded logits end up at -1e30 and vanish under exp in the log_softmax).
    b_out_kernel = jnp.full((1, OUT_PAD), -1e30, jnp.float32)
    b_out_kernel = b_out_kernel.at[0, :output_size].set(b_out_pt)

    return {
        # kernel-layout params
        "embedding": emb,                                        # (O, H)
        "w_ih": _pad_lanes(w_ih_pt.T, GATE_PAD),                 # (H, 128)
        "w_hh": _pad_lanes(w_hh_pt.T, GATE_PAD),                 # (H, 128)
        "b_ih": _pad_lanes(b_ih_eff.reshape(1, -1), GATE_PAD),   # (1, 128)
        "b_hh": _pad_lanes(b_hh_eff.reshape(1, -1), GATE_PAD),   # (1, 128)
        "w_out": _pad_lanes(w_out_pt.T, OUT_PAD),                # (H, 128)
        "b_out": b_out_kernel,                                   # (1, 128)
        # pristine PyTorch-layout copies (for the pure-JAX reference)
        "w_ih_pt": w_ih_pt, "w_hh_pt": w_hh_pt,
        "b_ih_pt": b_ih_pt, "b_hh_pt": b_hh_pt,
        "w_out_pt": w_out_pt, "b_out_pt": b_out_pt,
    }


def decoder_forward_ref(tokens, hidden, params):
    """Pure-JAX reference matching PyTorch semantics exactly (raw weights)."""
    H = HIDDEN
    wih, whh = params["w_ih_pt"], params["w_hh_pt"]
    bih, bhh = params["b_ih_pt"], params["b_hh_pt"]
    wout, bout = params["w_out_pt"], params["b_out_pt"]
    h = hidden.reshape(1, H)
    outs = []
    for t in range(tokens.shape[0]):
        x = jnp.maximum(params["embedding"][tokens[t]].reshape(1, H), 0.0)
        gi = x @ wih.T + bih
        gh = h @ whh.T + bhh
        r = jax.nn.sigmoid(gi[:, :H] + gh[:, :H])
        z = jax.nn.sigmoid(gi[:, H:2 * H] + gh[:, H:2 * H])
        n = jnp.tanh(gi[:, 2 * H:] + r * gh[:, 2 * H:])
        h = (1.0 - z) * n + z * h
        logits = h @ wout.T + bout
        outs.append(jax.nn.log_softmax(logits, axis=1))
    return jnp.concatenate(outs, axis=0), h.reshape(1, 1, H)


if __name__ == "__main__":
    key = jax.random.PRNGKey(0)
    pkey, hkey, tkey = jax.random.split(key, 3)
    params = init_params(pkey)

    T = 8
    tokens = jax.random.randint(tkey, (T,), 0, OUTPUT, dtype=jnp.int32)
    hidden = jax.random.normal(hkey, (1, 1, HIDDEN), jnp.float32)

    # Multi-step decode (whole loop inside one pallas_call).
    logp, h_new = decoder_decode(tokens, hidden, params)
    jax.block_until_ready((logp, h_new))

    logp_ref, h_ref = decoder_forward_ref(tokens, hidden, params)
    assert logp.shape == (T, OUTPUT) and h_new.shape == (1, 1, HIDDEN)
    assert jnp.allclose(logp, logp_ref, atol=1e-5, rtol=1e-5)
    assert jnp.allclose(h_new, h_ref, atol=1e-5, rtol=1e-5)

    # Single-step call matching the PyTorch module forward exactly.
    token = jnp.array([[5]], dtype=jnp.int32)
    lp1, h1 = decoder_forward(token, hidden, params)
    jax.block_until_ready((lp1, h1))
    lp1_ref, h1_ref = decoder_forward_ref(jnp.array([5], jnp.int32), hidden, params)
    assert lp1.shape == (1, OUTPUT) and h1.shape == (1, 1, HIDDEN)
    assert jnp.allclose(lp1, lp1_ref, atol=1e-5, rtol=1e-5)
    assert jnp.allclose(h1, h1_ref, atol=1e-5, rtol=1e-5)

    # TODO(synk): batch=1 decode leaves the MXU mostly idle by construction; batching
    # beams/sequences into the M dimension (and sharding that batch across the two
    # v7x TensorCores via a parallel grid axis) is the remaining large win.
    print("KERNEL_OK")
</pallas_src>

<mosaic_0001>
module attributes {stable_mosaic.version = 11 : i64} {
  func.func @decoder_seq_kernel(%arg0: memref<8xi32, #tpu.memory_space<smem>>, %arg1: memref<1x32xf32, #tpu.memory_space<vmem>>, %arg2: memref<64x32xf32, #tpu.memory_space<vmem>>, %arg3: memref<32x128xf32, #tpu.memory_space<vmem>>, %arg4: memref<32x128xf32, #tpu.memory_space<vmem>>, %arg5: memref<1x128xf32, #tpu.memory_space<vmem>>, %arg6: memref<1x128xf32, #tpu.memory_space<vmem>>, %arg7: memref<32x128xf32, #tpu.memory_space<vmem>>, %arg8: memref<1x128xf32, #tpu.memory_space<vmem>>, %arg9: memref<8x128xf32, #tpu.memory_space<vmem>>, %arg10: memref<1x32xf32, #tpu.memory_space<vmem>>, %arg11: memref<8x32xf32, #tpu.memory_space<vmem>>, %arg12: memref<8x128xf32, #tpu.memory_space<vmem>>, %arg13: memref<8x32xf32, #tpu.memory_space<vmem>>) attributes {dimension_semantics = [], scalar_prefetch = 0 : i64, scratch_operands = 3 : i64, tpu.core_type = #tpu.core_type<tc>} {
    %c0_i32 = arith.constant 0 : i32
    %0 = arith.index_cast %c0_i32 : i32 to index
    %1 = memref.load %arg0[%0] : memref<8xi32, #tpu.memory_space<smem>>
    %2 = arith.index_cast %1 : i32 to index
    %c0 = arith.constant 0 : index
    %3 = vector.load %arg2[%2, %c0] : memref<64x32xf32, #tpu.memory_space<vmem>>, vector<1x32xf32>
    %4 = arith.index_cast %c0_i32 : i32 to index
    %c0_0 = arith.constant 0 : index
    %5 = vector.load %arg11[%4, %c0_0] : memref<8x32xf32, #tpu.memory_space<vmem>>, vector<1x32xf32>
    tpu.vector_store %arg11[%4, %c0_0], %3 {strides = array<i32>} : memref<8x32xf32, #tpu.memory_space<vmem>>, vector<1x32xf32>,
    %c1_i32 = arith.constant 1 : i32
    %6 = arith.index_cast %c1_i32 : i32 to index
    %7 = memref.load %arg0[%6] : memref<8xi32, #tpu.memory_space<smem>>
    %8 = arith.index_cast %7 : i32 to index
    %c0_1 = arith.constant 0 : index
    %9 = vector.load %arg2[%8, %c0_1] : memref<64x32xf32, #tpu.memory_space<vmem>>, vector<1x32xf32>
    %10 = arith.index_cast %c1_i32 : i32 to index
    %c0_2 = arith.constant 0 : index
    %11 = vector.load %arg11[%10, %c0_2] : memref<8x32xf32, #tpu.memory_space<vmem>>, vector<1x32xf32>
    tpu.vector_store %arg11[%10, %c0_2], %9 {strides = array<i32>} : memref<8x32xf32, #tpu.memory_space<vmem>>, vector<1x32xf32>,
    %c2_i32 = arith.constant 2 : i32
    %12 = arith.index_cast %c2_i32 : i32 to index
    %13 = memref.load %arg0[%12] : memref<8xi32, #tpu.memory_space<smem>>
    %14 = arith.index_cast %13 : i32 to index
    %c0_3 = arith.constant 0 : index
    %15 = vector.load %arg2[%14, %c0_3] : memref<64x32xf32, #tpu.memory_space<vmem>>, vector<1x32xf32>
    %16 = arith.index_cast %c2_i32 : i32 to index
    %c0_4 = arith.constant 0 : index
    %17 = vector.load %arg11[%16, %c0_4] : memref<8x32xf32, #tpu.memory_space<vmem>>, vector<1x32xf32>
    tpu.vector_store %arg11[%16, %c0_4], %15 {strides = array<i32>} : memref<8x32xf32, #tpu.memory_space<vmem>>, vector<1x32xf32>,
    %c3_i32 = arith.constant 3 : i32
    %18 = arith.index_cast %c3_i32 : i32 to index
    %19 = memref.load %arg0[%18] : memref<8xi32, #tpu.memory_space<smem>>
    %20 = arith.index_cast %19 : i32 to index
    %c0_5 = arith.constant 0 : index
    %21 = vector.load %arg2[%20, %c0_5] : memref<64x32xf32, #tpu.memory_space<vmem>>, vector<1x32xf32>
    %22 = arith.index_cast %c3_i32 : i32 to index
    %c0_6 = arith.constant 0 : index
    %23 = vector.load %arg11[%22, %c0_6] : memref<8x32xf32, #tpu.memory_space<vmem>>, vector<1x32xf32>
    tpu.vector_store %arg11[%22, %c0_6], %21 {strides = array<i32>} : memref<8x32xf32, #tpu.memory_space<vmem>>, vector<1x32xf32>,
    %c4_i32 = arith.constant 4 : i32
    %24 = arith.index_cast %c4_i32 : i32 to index
    %25 = memref.load %arg0[%24] : memref<8xi32, #tpu.memory_space<smem>>
    %26 = arith.index_cast %25 : i32 to index
    %c0_7 = arith.constant 0 : index
    %27 = vector.load %arg2[%26, %c0_7] : memref<64x32xf32, #tpu.memory_space<vmem>>, vector<1x32xf32>
    %28 = arith.index_cast %c4_i32 : i32 to index
    %c0_8 = arith.constant 0 : index
    %29 = vector.load %arg11[%28, %c0_8] : memref<8x32xf32, #tpu.memory_space<vmem>>, vector<1x32xf32>
    tpu.vector_store %arg11[%28, %c0_8], %27 {strides = array<i32>} : memref<8x32xf32, #tpu.memory_space<vmem>>, vector<1x32xf32>,
    %c5_i32 = arith.constant 5 : i32
    %30 = arith.index_cast %c5_i32 : i32 to index
    %31 = memref.load %arg0[%30] : memref<8xi32, #tpu.memory_space<smem>>
    %32 = arith.index_cast %31 : i32 to index
    %c0_9 = arith.constant 0 : index
    %33 = vector.load %arg2[%32, %c0_9] : memref<64x32xf32, #tpu.memory_space<vmem>>, vector<1x32xf32>
    %34 = arith.index_cast %c5_i32 : i32 to index
    %c0_10 = arith.constant 0 : index
    %35 = vector.load %arg11[%34, %c0_10] : memref<8x32xf32, #tpu.memory_space<vmem>>, vector<1x32xf32>
    tpu.vector_store %arg11[%34, %c0_10], %33 {strides = array<i32>} : memref<8x32xf32, #tpu.memory_space<vmem>>, vector<1x32xf32>,
    %c6_i32 = arith.constant 6 : i32
    %36 = arith.index_cast %c6_i32 : i32 to index
    %37 = memref.load %arg0[%36] : memref<8xi32, #tpu.memory_space<smem>>
    %38 = arith.index_cast %37 : i32 to index
    %c0_11 = arith.constant 0 : index
    %39 = vector.load %arg2[%38, %c0_11] : memref<64x32xf32, #tpu.memory_space<vmem>>, vector<1x32xf32>
    %40 = arith.index_cast %c6_i32 : i32 to index
    %c0_12 = arith.constant 0 : index
    %41 = vector.load %arg11[%40, %c0_12] : memref<8x32xf32, #tpu.memory_space<vmem>>, vector<1x32xf32>
    tpu.vector_store %arg11[%40, %c0_12], %39 {strides = array<i32>} : memref<8x32xf32, #tpu.memory_space<vmem>>, vector<1x32xf32>,
    %c7_i32 = arith.constant 7 : i32
    %42 = arith.index_cast %c7_i32 : i32 to index
    %43 = memref.load %arg0[%42] : memref<8xi32, #tpu.memory_space<smem>>
    %44 = arith.index_cast %43 : i32 to index
    %c0_13 = arith.constant 0 : index
    %45 = vector.load %arg2[%44, %c0_13] : memref<64x32xf32, #tpu.memory_space<vmem>>, vector<1x32xf32>
    %46 = arith.index_cast %c7_i32 : i32 to index
    %c0_14 = arith.constant 0 : index
    %47 = vector.load %arg11[%46, %c0_14] : memref<8x32xf32, #tpu.memory_space<vmem>>, vector<1x32xf32>
    tpu.vector_store %arg11[%46, %c0_14], %45 {strides = array<i32>} : memref<8x32xf32, #tpu.memory_space<vmem>>, vector<1x32xf32>,
    %c8_i32 = arith.constant 8 : i32
    %c0_15 = arith.constant 0 : index
    %c0_16 = arith.constant 0 : index
    %48 = vector.load %arg11[%c0_15, %c0_16] : memref<8x32xf32, #tpu.memory_space<vmem>>, vector<8x32xf32>
    %cst = arith.constant 0.000000e+00 : f32
    %49 = vector.broadcast %cst : f32 to vector<8x32xf32>
    %50 = arith.maximumf %48, %49 : vector<8x32xf32>
    %c0_17 = arith.constant 0 : index
    %c0_18 = arith.constant 0 : index
    %51 = vector.load %arg3[%c0_17, %c0_18] : memref<32x128xf32, #tpu.memory_space<vmem>>, vector<32x128xf32>
    %cst_19 = arith.constant dense<0.000000e+00> : vector<8x128xf32>
    %52 = tpu.matmul %50, %51, %cst_19 {dimension_numbers = #tpu.dot_dimension_numbers<[1], [0], [0], [1], [0, 0, 1, 1], [], []>} : vector<8x32xf32>, vector<32x128xf32>, vector<8x128xf32> -> vector<8x128xf32>
    %c0_20 = arith.constant 0 : index
    %c0_21 = arith.constant 0 : index
    %53 = vector.load %arg5[%c0_20, %c0_21] : memref<1x128xf32, #tpu.memory_space<vmem>>, vector<1x128xf32>
    %54 = vector.broadcast %53 : vector<1x128xf32> to vector<8x128xf32>
    %55 = arith.addf %52, %54 : vector<8x128xf32>
    %c0_22 = arith.constant 0 : index
    %c0_23 = arith.constant 0 : index
    %56 = vector.load %arg12[%c0_22, %c0_23] : memref<8x128xf32, #tpu.memory_space<vmem>>, vector<8x128xf32>
    tpu.vector_store %arg12[%c0_22, %c0_23], %55 {strides = array<i32>} : memref<8x128xf32, #tpu.memory_space<vmem>>, vector<8x128xf32>,
    %c0_24 = arith.constant 0 : index
    %c0_25 = arith.constant 0 : index
    %57 = vector.load %arg4[%c0_24, %c0_25] : memref<32x128xf32, #tpu.memory_space<vmem>>, vector<32x128xf32>
    %c0_26 = arith.constant 0 : index
    %c0_27 = arith.constant 0 : index
    %58 = vector.load %arg6[%c0_26, %c0_27] : memref<1x128xf32, #tpu.memory_space<vmem>>, vector<1x128xf32>
    %c0_28 = arith.constant 0 : index
    %c0_29 = arith.constant 0 : index
    %59 = vector.load %arg1[%c0_28, %c0_29] : memref<1x32xf32, #tpu.memory_space<vmem>>, vector<1x32xf32>
    %c0_i32_30 = arith.constant 0 : i32
    %60 = arith.index_cast %c0_i32_30 : i32 to index
    %c0_31 = arith.constant 0 : index
    %61 = vector.load %arg12[%60, %c0_31] : memref<8x128xf32, #tpu.memory_space<vmem>>, vector<1x128xf32>
    %cst_32 = arith.constant dense<0.000000e+00> : vector<1x128xf32>
    %62 = tpu.matmul %59, %57, %cst_32 {dimension_numbers = #tpu.dot_dimension_numbers<[1], [0], [0], [1], [0, 0, 1, 1], [], []>} : vector<1x32xf32>, vector<32x128xf32>, vector<1x128xf32> -> vector<1x128xf32>
    %63 = arith.addf %62, %58 : vector<1x128xf32>
    %64 = vector.extract_strided_slice %61 {offsets = [0, 0], sizes = [1, 64], strides = [1, 1]} : vector<1x128xf32> to vector<1x64xf32>
    %65 = vector.extract_strided_slice %63 {offsets = [0, 0], sizes = [1, 64], strides = [1, 1]} : vector<1x128xf32> to vector<1x64xf32>
    %66 = arith.addf %64, %65 : vector<1x64xf32>
    %67 = arith.negf %66 : vector<1x64xf32>
    %68 = math.exp %67 : vector<1x64xf32>
    %cst_33 = arith.constant 1.000000e+00 : f32
    %69 = vector.broadcast %cst_33 : f32 to vector<1x64xf32>
    %70 = arith.addf %69, %68 : vector<1x64xf32>
    %71 = arith.divf %69, %70 : vector<1x64xf32>
    %72 = vector.extract_strided_slice %71 {offsets = [0, 0], sizes = [1, 32], strides = [1, 1]} : vector<1x64xf32> to vector<1x32xf32>
    %73 = vector.extract_strided_slice %71 {offsets = [0, 32], sizes = [1, 32], strides = [1, 1]} : vector<1x64xf32> to vector<1x32xf32>
    %74 = vector.extract_strided_slice %61 {offsets = [0, 64], sizes = [1, 32], strides = [1, 1]} : vector<1x128xf32> to vector<1x32xf32>
    %75 = vector.extract_strided_slice %63 {offsets = [0, 64], sizes = [1, 32], strides = [1, 1]} : vector<1x128xf32> to vector<1x32xf32>
    %76 = arith.mulf %72, %75 : vector<1x32xf32>
    %77 = arith.addf %74, %76 : vector<1x32xf32>
    %78 = math.tanh %77 : vector<1x32xf32>
    %cst_34 = arith.constant 1.000000e+00 : f32
    %79 = vector.broadcast %cst_34 : f32 to vector<1x32xf32>
    %80 = arith.subf %79, %73 : vector<1x32xf32>
    %81 = arith.mulf %80, %78 : vector<1x32xf32>
    %82 = arith.mulf %73, %59 : vector<1x32xf32>
    %83 = arith.addf %81, %82 : vector<1x32xf32>
    %84 = arith.index_cast %c0_i32_30 : i32 to index
    %c0_35 = arith.constant 0 : index
    %85 = vector.load %arg13[%84, %c0_35] : memref<8x32xf32, #tpu.memory_space<vmem>>, vector<1x32xf32>
    tpu.vector_store %arg13[%84, %c0_35], %83 {strides = array<i32>} : memref<8x32xf32, #tpu.memory_space<vmem>>, vector<1x32xf32>,
    %c1_i32_36 = arith.constant 1 : i32
    %86 = arith.index_cast %c1_i32_36 : i32 to index
    %c0_37 = arith.constant 0 : index
    %87 = vector.load %arg12[%86, %c0_37] : memref<8x128xf32, #tpu.memory_space<vmem>>, vector<1x128xf32>
    %cst_38 = arith.constant dense<0.000000e+00> : vector<1x128xf32>
    %88 = tpu.matmul %83, %57, %cst_38 {dimension_numbers = #tpu.dot_dimension_numbers<[1], [0], [0], [1], [0, 0, 1, 1], [], []>} : vector<1x32xf32>, vector<32x128xf32>, vector<1x128xf32> -> vector<1x128xf32>
    %89 = arith.addf %88, %58 : vector<1x128xf32>
    %90 = vector.extract_strided_slice %87 {offsets = [0, 0], sizes = [1, 64], strides = [1, 1]} : vector<1x128xf32> to vector<1x64xf32>
    %91 = vector.extract_strided_slice %89 {offsets = [0, 0], sizes = [1, 64], strides = [1, 1]} : vector<1x128xf32> to vector<1x64xf32>
    %92 = arith.addf %90, %91 : vector<1x64xf32>
    %93 = arith.negf %92 : vector<1x64xf32>
    %94 = math.exp %93 : vector<1x64xf32>
    %cst_39 = arith.constant 1.000000e+00 : f32
    %95 = vector.broadcast %cst_39 : f32 to vector<1x64xf32>
    %96 = arith.addf %95, %94 : vector<1x64xf32>
    %97 = arith.divf %95, %96 : vector<1x64xf32>
    %98 = vector.extract_strided_slice %97 {offsets = [0, 0], sizes = [1, 32], strides = [1, 1]} : vector<1x64xf32> to vector<1x32xf32>
    %99 = vector.extract_strided_slice %97 {offsets = [0, 32], sizes = [1, 32], strides = [1, 1]} : vector<1x64xf32> to vector<1x32xf32>
    %100 = vector.extract_strided_slice %87 {offsets = [0, 64], sizes = [1, 32], strides = [1, 1]} : vector<1x128xf32> to vector<1x32xf32>
    %101 = vector.extract_strided_slice %89 {offsets = [0, 64], sizes = [1, 32], strides = [1, 1]} : vector<1x128xf32> to vector<1x32xf32>
    %102 = arith.mulf %98, %101 : vector<1x32xf32>
    %103 = arith.addf %100, %102 : vector<1x32xf32>
    %104 = math.tanh %103 : vector<1x32xf32>
    %cst_40 = arith.constant 1.000000e+00 : f32
    %105 = vector.broadcast %cst_40 : f32 to vector<1x32xf32>
    %106 = arith.subf %105, %99 : vector<1x32xf32>
    %107 = arith.mulf %106, %104 : vector<1x32xf32>
    %108 = arith.mulf %99, %83 : vector<1x32xf32>
    %109 = arith.addf %107, %108 : vector<1x32xf32>
    %110 = arith.index_cast %c1_i32_36 : i32 to index
    %c0_41 = arith.constant 0 : index
    %111 = vector.load %arg13[%110, %c0_41] : memref<8x32xf32, #tpu.memory_space<vmem>>, vector<1x32xf32>
    tpu.vector_store %arg13[%110, %c0_41], %109 {strides = array<i32>} : memref<8x32xf32, #tpu.memory_space<vmem>>, vector<1x32xf32>,
    %c2_i32_42 = arith.constant 2 : i32
    %112 = arith.index_cast %c2_i32_42 : i32 to index
    %c0_43 = arith.constant 0 : index
    %113 = vector.load %arg12[%112, %c0_43] : memref<8x128xf32, #tpu.memory_space<vmem>>, vector<1x128xf32>
    %cst_44 = arith.constant dense<0.000000e+00> : vector<1x128xf32>
    %114 = tpu.matmul %109, %57, %cst_44 {dimension_numbers = #tpu.dot_dimension_numbers<[1], [0], [0], [1], [0, 0, 1, 1], [], []>} : vector<1x32xf32>, vector<32x128xf32>, vector<1x128xf32> -> vector<1x128xf32>
    %115 = arith.addf %114, %58 : vector<1x128xf32>
    %116 = vector.extract_strided_slice %113 {offsets = [0, 0], sizes = [1, 64], strides = [1, 1]} : vector<1x128xf32> to vector<1x64xf32>
    %117 = vector.extract_strided_slice %115 {offsets = [0, 0], sizes = [1, 64], strides = [1, 1]} : vector<1x128xf32> to vector<1x64xf32>
    %118 = arith.addf %116, %117 : vector<1x64xf32>
    %119 = arith.negf %118 : vector<1x64xf32>
    %120 = math.exp %119 : vector<1x64xf32>
    %cst_45 = arith.constant 1.000000e+00 : f32
    %121 = vector.broadcast %cst_45 : f32 to vector<1x64xf32>
    %122 = arith.addf %121, %120 : vector<1x64xf32>
    %123 = arith.divf %121, %122 : vector<1x64xf32>
    %124 = vector.extract_strided_slice %123 {offsets = [0, 0], sizes = [1, 32], strides = [1, 1]} : vector<1x64xf32> to vector<1x32xf32>
    %125 = vector.extract_strided_slice %123 {offsets = [0, 32], sizes = [1, 32], strides = [1, 1]} : vector<1x64xf32> to vector<1x32xf32>
    %126 = vector.extract_strided_slice %113 {offsets = [0, 64], sizes = [1, 32], strides = [1, 1]} : vector<1x128xf32> to vector<1x32xf32>
    %127 = vector.extract_strided_slice %115 {offsets = [0, 64], sizes = [1, 32], strides = [1, 1]} : vector<1x128xf32> to vector<1x32xf32>
    %128 = arith.mulf %124, %127 : vector<1x32xf32>
    %129 = arith.addf %126, %128 : vector<1x32xf32>
    %130 = math.tanh %129 : vector<1x32xf32>
    %cst_46 = arith.constant 1.000000e+00 : f32
    %131 = vector.broadcast %cst_46 : f32 to vector<1x32xf32>
    %132 = arith.subf %131, %125 : vector<1x32xf32>
    %133 = arith.mulf %132, %130 : vector<1x32xf32>
    %134 = arith.mulf %125, %109 : vector<1x32xf32>
    %135 = arith.addf %133, %134 : vector<1x32xf32>
    %136 = arith.index_cast %c2_i32_42 : i32 to index
    %c0_47 = arith.constant 0 : index
    %137 = vector.load %arg13[%136, %c0_47] : memref<8x32xf32, #tpu.memory_space<vmem>>, vector<1x32xf32>
    tpu.vector_store %arg13[%136, %c0_47], %135 {strides = array<i32>} : memref<8x32xf32, #tpu.memory_space<vmem>>, vector<1x32xf32>,
    %c3_i32_48 = arith.constant 3 : i32
    %138 = arith.index_cast %c3_i32_48 : i32 to index
    %c0_49 = arith.constant 0 : index
    %139 = vector.load %arg12[%138, %c0_49] : memref<8x128xf32, #tpu.memory_space<vmem>>, vector<1x128xf32>
    %cst_50 = arith.constant dense<0.000000e+00> : vector<1x128xf32>
    %140 = tpu.matmul %135, %57, %cst_50 {dimension_numbers = #tpu.dot_dimension_numbers<[1], [0], [0], [1], [0, 0, 1, 1], [], []>} : vector<1x32xf32>, vector<32x128xf32>, vector<1x128xf32> -> vector<1x128xf32>
    %141 = arith.addf %140, %58 : vector<1x128xf32>
    %142 = vector.extract_strided_slice %139 {offsets = [0, 0], sizes = [1, 64], strides = [1, 1]} : vector<1x128xf32> to vector<1x64xf32>
    %143 = vector.extract_strided_slice %141 {offsets = [0, 0], sizes = [1, 64], strides = [1, 1]} : vector<1x128xf32> to vector<1x64xf32>
    %144 = arith.addf %142, %143 : vector<1x64xf32>
    %145 = arith.negf %144 : vector<1x64xf32>
    %146 = math.exp %145 : vector<1x64xf32>
    %cst_51 = arith.constant 1.000000e+00 : f32
    %147 = vector.broadcast %cst_51 : f32 to vector<1x64xf32>
    %148 = arith.addf %147, %146 : vector<1x64xf32>
    %149 = arith.divf %147, %148 : vector<1x64xf32>
    %150 = vector.extract_strided_slice %149 {offsets = [0, 0], sizes = [1, 32], strides = [1, 1]} : vector<1x64xf32> to vector<1x32xf32>
    %151 = vector.extract_strided_slice %149 {offsets = [0, 32], sizes = [1, 32], strides = [1, 1]} : vector<1x64xf32> to vector<1x32xf32>
    %152 = vector.extract_strided_slice %139 {offsets = [0, 64], sizes = [1, 32], strides = [1, 1]} : vector<1x128xf32> to vector<1x32xf32>
    %153 = vector.extract_strided_slice %141 {offsets = [0, 64], sizes = [1, 32], strides = [1, 1]} : vector<1x128xf32> to vector<1x32xf32>
    %154 = arith.mulf %150, %153 : vector<1x32xf32>
    %155 = arith.addf %152, %154 : vector<1x32xf32>
    %156 = math.tanh %155 : vector<1x32xf32>
    %cst_52 = arith.constant 1.000000e+00 : f32
    %157 = vector.broadcast %cst_52 : f32 to vector<1x32xf32>
    %158 = arith.subf %157, %151 : vector<1x32xf32>
    %159 = arith.mulf %158, %156 : vector<1x32xf32>
    %160 = arith.mulf %151, %135 : vector<1x32xf32>
    %161 = arith.addf %159, %160 : vector<1x32xf32>
    %162 = arith.index_cast %c3_i32_48 : i32 to index
    %c0_53 = arith.constant 0 : index
    %163 = vector.load %arg13[%162, %c0_53] : memref<8x32xf32, #tpu.memory_space<vmem>>, vector<1x32xf32>
    tpu.vector_store %arg13[%162, %c0_53], %161 {strides = array<i32>} : memref<8x32xf32, #tpu.memory_space<vmem>>, vector<1x32xf32>,
    %c4_i32_54 = arith.constant 4 : i32
    %164 = arith.index_cast %c4_i32_54 : i32 to index
    %c0_55 = arith.constant 0 : index
    %165 = vector.load %arg12[%164, %c0_55] : memref<8x128xf32, #tpu.memory_space<vmem>>, vector<1x128xf32>
    %cst_56 = arith.constant dense<0.000000e+00> : vector<1x128xf32>
    %166 = tpu.matmul %161, %57, %cst_56 {dimension_numbers = #tpu.dot_dimension_numbers<[1], [0], [0], [1], [0, 0, 1, 1], [], []>} : vector<1x32xf32>, vector<32x128xf32>, vector<1x128xf32> -> vector<1x128xf32>
    %167 = arith.addf %166, %58 : vector<1x128xf32>
    %168 = vector.extract_strided_slice %165 {offsets = [0, 0], sizes = [1, 64], strides = [1, 1]} : vector<1x128xf32> to vector<1x64xf32>
    %169 = vector.extract_strided_slice %167 {offsets = [0, 0], sizes = [1, 64], strides = [1, 1]} : vector<1x128xf32> to vector<1x64xf32>
    %170 = arith.addf %168, %169 : vector<1x64xf32>
    %171 = arith.negf %170 : vector<1x64xf32>
    %172 = math.exp %171 : vector<1x64xf32>
    %cst_57 = arith.constant 1.000000e+00 : f32
    %173 = vector.broadcast %cst_57 : f32 to vector<1x64xf32>
    %174 = arith.addf %173, %172 : vector<1x64xf32>
    %175 = arith.divf %173, %174 : vector<1x64xf32>
    %176 = vector.extract_strided_slice %175 {offsets = [0, 0], sizes = [1, 32], strides = [1, 1]} : vector<1x64xf32> to vector<1x32xf32>
    %177 = vector.extract_strided_slice %175 {offsets = [0, 32], sizes = [1, 32], strides = [1, 1]} : vector<1x64xf32> to vector<1x32xf32>
    %178 = vector.extract_strided_slice %165 {offsets = [0, 64], sizes = [1, 32], strides = [1, 1]} : vector<1x128xf32> to vector<1x32xf32>
    %179 = vector.extract_strided_slice %167 {offsets = [0, 64], sizes = [1, 32], strides = [1, 1]} : vector<1x128xf32> to vector<1x32xf32>
    %180 = arith.mulf %176, %179 : vector<1x32xf32>
    %181 = arith.addf %178, %180 : vector<1x32xf32>
    %182 = math.tanh %181 : vector<1x32xf32>
    %cst_58 = arith.constant 1.000000e+00 : f32
    %183 = vector.broadcast %cst_58 : f32 to vector<1x32xf32>
    %184 = arith.subf %183, %177 : vector<1x32xf32>
    %185 = arith.mulf %184, %182 : vector<1x32xf32>
    %186 = arith.mulf %177, %161 : vector<1x32xf32>
    %187 = arith.addf %185, %186 : vector<1x32xf32>
    %188 = arith.index_cast %c4_i32_54 : i32 to index
    %c0_59 = arith.constant 0 : index
    %189 = vector.load %arg13[%188, %c0_59] : memref<8x32xf32, #tpu.memory_space<vmem>>, vector<1x32xf32>
    tpu.vector_store %arg13[%188, %c0_59], %187 {strides = array<i32>} : memref<8x32xf32, #tpu.memory_space<vmem>>, vector<1x32xf32>,
    %c5_i32_60 = arith.constant 5 : i32
    %190 = arith.index_cast %c5_i32_60 : i32 to index
    %c0_61 = arith.constant 0 : index
    %191 = vector.load %arg12[%190, %c0_61] : memref<8x128xf32, #tpu.memory_space<vmem>>, vector<1x128xf32>
    %cst_62 = arith.constant dense<0.000000e+00> : vector<1x128xf32>
    %192 = tpu.matmul %187, %57, %cst_62 {dimension_numbers = #tpu.dot_dimension_numbers<[1], [0], [0], [1], [0, 0, 1, 1], [], []>} : vector<1x32xf32>, vector<32x128xf32>, vector<1x128xf32> -> vector<1x128xf32>
    %193 = arith.addf %192, %58 : vector<1x128xf32>
    %194 = vector.extract_strided_slice %191 {offsets = [0, 0], sizes = [1, 64], strides = [1, 1]} : vector<1x128xf32> to vector<1x64xf32>
    %195 = vector.extract_strided_slice %193 {offsets = [0, 0], sizes = [1, 64], strides = [1, 1]} : vector<1x128xf32> to vector<1x64xf32>
    %196 = arith.addf %194, %195 : vector<1x64xf32>
    %197 = arith.negf %196 : vector<1x64xf32>
    %198 = math.exp %197 : vector<1x64xf32>
    %cst_63 = arith.constant 1.000000e+00 : f32
    %199 = vector.broadcast %cst_63 : f32 to vector<1x64xf32>
    %200 = arith.addf %199, %198 : vector<1x64xf32>
    %201 = arith.divf %199, %200 : vector<1x64xf32>
    %202 = vector.extract_strided_slice %201 {offsets = [0, 0], sizes = [1, 32], strides = [1, 1]} : vector<1x64xf32> to vector<1x32xf32>
    %203 = vector.extract_strided_slice %201 {offsets = [0, 32], sizes = [1, 32], strides = [1, 1]} : vector<1x64xf32> to vector<1x32xf32>
    %204 = vector.extract_strided_slice %191 {offsets = [0, 64], sizes = [1, 32], strides = [1, 1]} : vector<1x128xf32> to vector<1x32xf32>
    %205 = vector.extract_strided_slice %193 {offsets = [0, 64], sizes = [1, 32], strides = [1, 1]} : vector<1x128xf32> to vector<1x32xf32>
    %206 = arith.mulf %202, %205 : vector<1x32xf32>
    %207 = arith.addf %204, %206 : vector<1x32xf32>
    %208 = math.tanh %207 : vector<1x32xf32>
    %cst_64 = arith.constant 1.000000e+00 : f32
    %209 = vector.broadcast %cst_64 : f32 to vector<1x32xf32>
    %210 = arith.subf %209, %203 : vector<1x32xf32>
    %211 = arith.mulf %210, %208 : vector<1x32xf32>
    %212 = arith.mulf %203, %187 : vector<1x32xf32>
    %213 = arith.addf %211, %212 : vector<1x32xf32>
    %214 = arith.index_cast %c5_i32_60 : i32 to index
    %c0_65 = arith.constant 0 : index
    %215 = vector.load %arg13[%214, %c0_65] : memref<8x32xf32, #tpu.memory_space<vmem>>, vector<1x32xf32>
    tpu.vector_store %arg13[%214, %c0_65], %213 {strides = array<i32>} : memref<8x32xf32, #tpu.memory_space<vmem>>, vector<1x32xf32>,
    %c6_i32_66 = arith.constant 6 : i32
    %216 = arith.index_cast %c6_i32_66 : i32 to index
    %c0_67 = arith.constant 0 : index
    %217 = vector.load %arg12[%216, %c0_67] : memref<8x128xf32, #tpu.memory_space<vmem>>, vector<1x128xf32>
    %cst_68 = arith.constant dense<0.000000e+00> : vector<1x128xf32>
    %218 = tpu.matmul %213, %57, %cst_68 {dimension_numbers = #tpu.dot_dimension_numbers<[1], [0], [0], [1], [0, 0, 1, 1], [], []>} : vector<1x32xf32>, vector<32x128xf32>, vector<1x128xf32> -> vector<1x128xf32>
    %219 = arith.addf %218, %58 : vector<1x128xf32>
    %220 = vector.extract_strided_slice %217 {offsets = [0, 0], sizes = [1, 64], strides = [1, 1]} : vector<1x128xf32> to vector<1x64xf32>
    %221 = vector.extract_strided_slice %219 {offsets = [0, 0], sizes = [1, 64], strides = [1, 1]} : vector<1x128xf32> to vector<1x64xf32>
    %222 = arith.addf %220, %221 : vector<1x64xf32>
    %223 = arith.negf %222 : vector<1x64xf32>
    %224 = math.exp %223 : vector<1x64xf32>
    %cst_69 = arith.constant 1.000000e+00 : f32
    %225 = vector.broadcast %cst_69 : f32 to vector<1x64xf32>
    %226 = arith.addf %225, %224 : vector<1x64xf32>
    %227 = arith.divf %225, %226 : vector<1x64xf32>
    %228 = vector.extract_strided_slice %227 {offsets = [0, 0], sizes = [1, 32], strides = [1, 1]} : vector<1x64xf32> to vector<1x32xf32>
    %229 = vector.extract_strided_slice %227 {offsets = [0, 32], sizes = [1, 32], strides = [1, 1]} : vector<1x64xf32> to vector<1x32xf32>
    %230 = vector.extract_strided_slice %217 {offsets = [0, 64], sizes = [1, 32], strides = [1, 1]} : vector<1x128xf32> to vector<1x32xf32>
    %231 = vector.extract_strided_slice %219 {offsets = [0, 64], sizes = [1, 32], strides = [1, 1]} : vector<1x128xf32> to vector<1x32xf32>
    %232 = arith.mulf %228, %231 : vector<1x32xf32>
    %233 = arith.addf %230, %232 : vector<1x32xf32>
    %234 = math.tanh %233 : vector<1x32xf32>
    %cst_70 = arith.constant 1.000000e+00 : f32
    %235 = vector.broadcast %cst_70 : f32 to vector<1x32xf32>
    %236 = arith.subf %235, %229 : vector<1x32xf32>
    %237 = arith.mulf %236, %234 : vector<1x32xf32>
    %238 = arith.mulf %229, %213 : vector<1x32xf32>
    %239 = arith.addf %237, %238 : vector<1x32xf32>
    %240 = arith.index_cast %c6_i32_66 : i32 to index
    %c0_71 = arith.constant 0 : index
    %241 = vector.load %arg13[%240, %c0_71] : memref<8x32xf32, #tpu.memory_space<vmem>>, vector<1x32xf32>
    tpu.vector_store %arg13[%240, %c0_71], %239 {strides = array<i32>} : memref<8x32xf32, #tpu.memory_space<vmem>>, vector<1x32xf32>,
    %c7_i32_72 = arith.constant 7 : i32
    %242 = arith.index_cast %c7_i32_72 : i32 to index
    %c0_73 = arith.constant 0 : index
    %243 = vector.load %arg12[%242, %c0_73] : memref<8x128xf32, #tpu.memory_space<vmem>>, vector<1x128xf32>
    %cst_74 = arith.constant dense<0.000000e+00> : vector<1x128xf32>
    %244 = tpu.matmul %239, %57, %cst_74 {dimension_numbers = #tpu.dot_dimension_numbers<[1], [0], [0], [1], [0, 0, 1, 1], [], []>} : vector<1x32xf32>, vector<32x128xf32>, vector<1x128xf32> -> vector<1x128xf32>
    %245 = arith.addf %244, %58 : vector<1x128xf32>
    %246 = vector.extract_strided_slice %243 {offsets = [0, 0], sizes = [1, 64], strides = [1, 1]} : vector<1x128xf32> to vector<1x64xf32>
    %247 = vector.extract_strided_slice %245 {offsets = [0, 0], sizes = [1, 64], strides = [1, 1]} : vector<1x128xf32> to vector<1x64xf32>
    %248 = arith.addf %246, %247 : vector<1x64xf32>
    %249 = arith.negf %248 : vector<1x64xf32>
    %250 = math.exp %249 : vector<1x64xf32>
    %cst_75 = arith.constant 1.000000e+00 : f32
    %251 = vector.broadcast %cst_75 : f32 to vector<1x64xf32>
    %252 = arith.addf %251, %250 : vector<1x64xf32>
    %253 = arith.divf %251, %252 : vector<1x64xf32>
    %254 = vector.extract_strided_slice %253 {offsets = [0, 0], sizes = [1, 32], strides = [1, 1]} : vector<1x64xf32> to vector<1x32xf32>
    %255 = vector.extract_strided_slice %253 {offsets = [0, 32], sizes = [1, 32], strides = [1, 1]} : vector<1x64xf32> to vector<1x32xf32>
    %256 = vector.extract_strided_slice %243 {offsets = [0, 64], sizes = [1, 32], strides = [1, 1]} : vector<1x128xf32> to vector<1x32xf32>
    %257 = vector.extract_strided_slice %245 {offsets = [0, 64], sizes = [1, 32], strides = [1, 1]} : vector<1x128xf32> to vector<1x32xf32>
    %258 = arith.mulf %254, %257 : vector<1x32xf32>
    %259 = arith.addf %256, %258 : vector<1x32xf32>
    %260 = math.tanh %259 : vector<1x32xf32>
    %cst_76 = arith.constant 1.000000e+00 : f32
    %261 = vector.broadcast %cst_76 : f32 to vector<1x32xf32>
    %262 = arith.subf %261, %255 : vector<1x32xf32>
    %263 = arith.mulf %262, %260 : vector<1x32xf32>
    %264 = arith.mulf %255, %239 : vector<1x32xf32>
    %265 = arith.addf %263, %264 : vector<1x32xf32>
    %266 = arith.index_cast %c7_i32_72 : i32 to index
    %c0_77 = arith.constant 0 : index
    %267 = vector.load %arg13[%266, %c0_77] : memref<8x32xf32, #tpu.memory_space<vmem>>, vector<1x32xf32>
    tpu.vector_store %arg13[%266, %c0_77], %265 {strides = array<i32>} : memref<8x32xf32, #tpu.memory_space<vmem>>, vector<1x32xf32>,
    %c8_i32_78 = arith.constant 8 : i32
    %c0_79 = arith.constant 0 : index
    %c0_80 = arith.constant 0 : index
    %268 = vector.load %arg10[%c0_79, %c0_80] : memref<1x32xf32, #tpu.memory_space<vmem>>, vector<1x32xf32>
    tpu.vector_store %arg10[%c0_79, %c0_80], %265 {strides = array<i32>} : memref<1x32xf32, #tpu.memory_space<vmem>>, vector<1x32xf32>,
    %c0_81 = arith.constant 0 : index
    %c0_82 = arith.constant 0 : index
    %269 = vector.load %arg13[%c0_81, %c0_82] : memref<8x32xf32, #tpu.memory_space<vmem>>, vector<8x32xf32>
    %c0_83 = arith.constant 0 : index
    %c0_84 = arith.constant 0 : index
    %270 = vector.load %arg7[%c0_83, %c0_84] : memref<32x128xf32, #tpu.memory_space<vmem>>, vector<32x128xf32>
    %cst_85 = arith.constant dense<0.000000e+00> : vector<8x128xf32>
    %271 = tpu.matmul %269, %270, %cst_85 {dimension_numbers = #tpu.dot_dimension_numbers<[1], [0], [0], [1], [0, 0, 1, 1], [], []>} : vector<8x32xf32>, vector<32x128xf32>, vector<8x128xf32> -> vector<8x128xf32>
    %c0_86 = arith.constant 0 : index
    %c0_87 = arith.constant 0 : index
    %272 = vector.load %arg8[%c0_86, %c0_87] : memref<1x128xf32, #tpu.memory_space<vmem>>, vector<1x128xf32>
    %273 = vector.broadcast %272 : vector<1x128xf32> to vector<8x128xf32>
    %274 = arith.addf %271, %273 : vector<8x128xf32>
    %cst_88 = arith.constant dense<0xFF800000> : vector<8xf32>
    %275 = vector.multi_reduction <maximumf>, %274, %cst_88 [1] : vector<8x128xf32> to vector<8xf32>
    %276 = vector.shape_cast %275 : vector<8xf32> to vector<8x1xf32>
    %277 = vector.broadcast %276 : vector<8x1xf32> to vector<8x128xf32>
    %278 = arith.subf %274, %277 : vector<8x128xf32>
    %279 = math.exp %278 : vector<8x128xf32>
    %cst_89 = arith.constant dense<0.000000e+00> : vector<8xf32>
    %280 = vector.multi_reduction <add>, %279, %cst_89 [1] : vector<8x128xf32> to vector<8xf32>
    %281 = vector.shape_cast %280 : vector<8xf32> to vector<8x1xf32>
    %282 = math.log %281 : vector<8x1xf32>
    %283 = vector.broadcast %282 : vector<8x1xf32> to vector<8x128xf32>
    %284 = arith.subf %278, %283 : vector<8x128xf32>
    %c0_90 = arith.constant 0 : index
    %c0_91 = arith.constant 0 : index
    %285 = vector.load %arg9[%c0_90, %c0_91] : memref<8x128xf32, #tpu.memory_space<vmem>>, vector<8x128xf32>
    tpu.vector_store %arg9[%c0_90, %c0_91], %284 {strides = array<i32>} : memref<8x128xf32, #tpu.memory_space<vmem>>, vector<8x128xf32>,
    return
  }
}

</mosaic_0001>

<bundles_post_ra>
// kernel: tpu_custom_call.1
= control target key start
LH: loop header
LB: loop body
LE: loop exit
PB: predicated region body
PF: predicated region fallthrough
CT: control target
= control target key end

     0   :  { %16 = vsyncpa [#allocation8], 0  ;;  %s1219_s0 = inlined_call_operand.hbm [shape: s32[8], index: 0, kind: input, shape index: {}]   ;;  %s1220_s1 = inlined_call_operand.hbm [shape: f32[1,32], index: 1, kind: input, shape index: {}]   ;;  %s1221_s2 = inlined_call_operand.vmem [shape: f32[64,32], index: 2, kind: input, shape index: {}]   ;;  %s1222_s3 = inlined_call_operand.vmem [shape: f32[32,128], index: 3, kind: input, shape index: {}]   ;;  %s1223_s4 = inlined_call_operand.vmem [shape: f32[32,128], index: 4, kind: input, shape index: {}]   ;;  %s1224_s5 = inlined_call_operand.vmem [shape: f32[1,128], index: 5, kind: input, shape index: {}]   ;;  %s1225_s6 = inlined_call_operand.vmem [shape: f32[1,128], index: 6, kind: input, shape index: {}]   ;;  %s1226_s7 = inlined_call_operand.vmem [shape: f32[32,128], index: 7, kind: input, shape index: {}]   ;;  %s1227_s8 = inlined_call_operand.vmem [shape: f32[1,128], index: 8, kind: input, shape index: {}]   ;;  %s1228_s9 = inlined_call_operand.hbm [shape: f32[8,128], index: 9, kind: output, shape index: {0}]   ;;  %s1229_s10 = inlined_call_operand.hbm [shape: f32[1,32], index: 10, kind: output, shape index: {1}]  }
   0x1   :  { %17 = vsyncpa [#allocation6], 0 }
   0x2   :  { %18 = vsyncpa [#allocation7], 0 }
   0x3   :  { %19 = vsyncpa [#allocation12], 0  ;;  %s25_s15 = sshll.u32 %s1219_s0, 4  ;;  %s34_s18 = sshll.u32 %s1220_s1, 4  ;;  %s26_s15 = int_to_ptr.hbm [resolvable:$true] %s25_s15  ;;  %s35_s18 = int_to_ptr.hbm [resolvable:$true] %s34_s18 }
   0x4   :  { %s943_s19 = smov [#allocation5]   ;;  %s944_s20 = smov [#allocation9]  }
   0x5   :  { %28 = dma.hbm_to_smem %s26_s15, 16, %s943_s19, [#allocation8]  }
   0x6   :  { %s36_s21 = sshll.u32 %s944_s20, 4  ;;  %s37_s21 = int_to_ptr.vmem [resolvable:$true] %s36_s21 }
   0x7   :  { %39 = dma.hbm_to_vmem [thread:$0]  %s35_s18, 16, %s37_s21, [#allocation6]  }
   0x8   :  { %935 = dma.done.wait [#allocation8], 16  }
   0x9   :  { %936 = vsyncadd [#allocation8], 4294967280 }
   0xa   :  { %937 = dma.done.wait [#allocation6], 16  }
   0xb   :  { %938 = vsyncadd [#allocation6], 4294967280 }
   0xc   :  { %62 = sfence }
   0xd   :  { %v1014_v0 = vld [vmem:[%s1223_s4 + $0x18] sm:$0xff]  ;;  %v1019_v1 = vld [vmem:[%s1223_s4 + $0x10] sm:$0xff]  ;;  %s1021_s1 = sld [smem:[#allocation5]]  ;;  %v1028_v2 = vld [vmem:[%s1223_s4 + $0x8] sm:$0xff]  ;;  %vm106_vm0 = vcmask 261120   ;;  %vm66_vm1 = vcmask 253952  }
   0xe   :  { %153 = vmatpush.msra.mxu1 %v1014_v0  ;;  %224 = vmatpush.msra.mxu2 %v1014_v0  ;;  %v101_v3 = vld [vmem:[%s1222_s3 + $0x18] sm:$0xff]  ;;  %v100_v4 = vld [vmem:[%s1222_s3 + $0x10] sm:$0xff]  ;;  %s1036_s11 = sld [smem:[#allocation5 + $0x1]]  ;;  %v1043_v5 = vld [vmem:[%s1223_s4] sm:$0xff]  ;;  %s729_s20 = sshll.u32 %s1228_s9, 4  ;;  %s730_s20 = int_to_ptr.hbm [resolvable:$true] %s729_s20 }
   0xf   :  { %291 = vmatpush.msra.mxu3 %v1014_v0  ;;  %122 = vmatpush.msra.mxu0 %v101_v3  ;;  %v99_v6 = vld [vmem:[%s1222_s3 + $0x8] sm:$0xff]  ;;  %s1048_s16 = sld [smem:[#allocation5 + $0x2]]  ;;  %v136_v7 = vld [vmem:[#allocation9] sm:$0x1]  ;;  %v98_v8 = vld [vmem:[%s1222_s3] sm:$0xff] }
  0x10   :  { %154 = vmatpush.msra.mxu1 %v1019_v1  ;;  %s1050_s17 = sld [smem:[#allocation5 + $0x3]]  ;;  %225 = vmatpush.msra.mxu2 %v1019_v1  ;;  %v1136_v19 = vld [vmem:[%s1225_s6] sm:$0x1]  ;;  %v796_v45 = vld [vmem:[#allocation9] ss:$0 sm:$0xff]  ;;  %s947_s6 = smov 32  }
  0x11   :  { %292 = vmatpush.msra.mxu3 %v1019_v1  ;;  %123 = vmatpush.msra.mxu0 %v100_v4  ;;  %s1055_s4 = sld [smem:[#allocation5 + $0x4]]  ;;  %v797_v22 = vld [vmem:[%s1224_s5] ss:$0 sm:$0xff]  ;;  %s946_s5 = smov 96  }
  0x12   :  { %155 = vmatpush.msra.mxu1 %v1028_v2  ;;  %s1064_s23 = sld [smem:[#allocation5 + $0x5]]  ;;  %226 = vmatpush.msra.mxu2 %v1028_v2 }
  0x13   :  { %s64_s22 = scalar_lea.vmem %s1221_s2, %s1021_s1  ;;  %293 = vmatpush.msra.mxu3 %v1028_v2  ;;  %124 = vmatpush.msra.mxu0 %v99_v6  ;;  %s1069_s0 = sld [smem:[#allocation5 + $0x6]] }
  0x14   :  { %156 = vmatpush.msra.mxu1 %v1043_v5  ;;  %v65_v9 = vld [vmem:[%s64_s22] sm:$0x1]  ;;  %s69_s1 = scalar_lea.vmem %s1221_s2, %s1036_s11  ;;  %s1077_s25 = sld [smem:[#allocation5 + $0x7]]  ;;  %227 = vmatpush.msra.mxu2 %v1043_v5 }
  0x15   :  { %772 = vmatmul.msk.f32.vlgmr.msra.gmra.mxu1 %vm106_vm0, %v136_v7  ;;  %67 = vst.msk [vmem:[#allocation2] sm:$0x1] %vm66_vm1, %v65_v9  ;;  %125 = vmatpush.msra.mxu0 %v98_v8  ;;  %v70_v10 = vld [vmem:[%s69_s1] sm:$0x1]  ;;  %s73_s28 = scalar_lea.vmem %s1221_s2, %s1048_s16 }
  0x16   :  { %294 = vmatpush.msra.mxu3 %v1043_v5  ;;  %71 = vst.msk [vmem:[#allocation2 + $0x1] sm:$0x1] %vm66_vm1, %v70_v10  ;;  %v74_v11 = vld [vmem:[%s73_s28] sm:$0x1]  ;;  %s77_s11 = scalar_lea.vmem %s1221_s2, %s1050_s17  ;;  %425 = vmatpush.msrb.mxu1 %v1014_v0 }
  0x17   :  { %358 = vmatpush.msrb.mxu0 %v1014_v0  ;;  %75 = vst.msk [vmem:[#allocation2 + $0x2] sm:$0x1] %vm66_vm1, %v74_v11  ;;  %v78_v12 = vld [vmem:[%s77_s11] sm:$0x1]  ;;  %s81_s14 = scalar_lea.vmem %s1221_s2, %s1055_s4  ;;  %492 = vmatpush.msrb.mxu2 %v1014_v0 }
  0x18   :  { %559 = vmatpush.msrb.mxu3 %v1014_v0  ;;  %79 = vst.msk [vmem:[#allocation2 + $0x3] sm:$0x1] %vm66_vm1, %v78_v12  ;;  %v82_v13 = vld [vmem:[%s81_s14] sm:$0x1]  ;;  %s85_s17 = scalar_lea.vmem %s1221_s2, %s1064_s23  ;;  %426 = vmatpush.msrb.mxu1 %v1019_v1 }
  0x19   :  { %359 = vmatpush.msrb.mxu0 %v1019_v1  ;;  %83 = vst.msk [vmem:[#allocation2 + $0x4] sm:$0x1] %vm66_vm1, %v82_v13  ;;  %v86_v14 = vld [vmem:[%s85_s17] sm:$0x1]  ;;  %s89_s19 = scalar_lea.vmem %s1221_s2, %s1069_s0  ;;  %493 = vmatpush.msrb.mxu2 %v1019_v1  ;;  %s945_s0 = smov 64  }
  0x1a   :  { %560 = vmatpush.msrb.mxu3 %v1019_v1  ;;  %87 = vst.msk [vmem:[#allocation2 + $0x5] sm:$0x1] %vm66_vm1, %v86_v14  ;;  %v90_v15 = vld [vmem:[%s89_s19] sm:$0x1]  ;;  %s93_s22 = scalar_lea.vmem %s1221_s2, %s1077_s25  ;;  %427 = vmatpush.msrb.mxu1 %v1028_v2  ;;  %s740_s17 = sshll.u32 %s1229_s10, 4  ;;  %s741_s17 = int_to_ptr.hbm [resolvable:$true] %s740_s17 }
  0x1b   :  { %360 = vmatpush.msrb.mxu0 %v1028_v2  ;;  %91 = vst.msk [vmem:[#allocation2 + $0x6] sm:$0x1] %vm66_vm1, %v90_v15  ;;  %v94_v16 = vld [vmem:[%s93_s22] sm:$0x1]  ;;  %494 = vmatpush.msrb.mxu2 %v1028_v2 }
  0x1c   :  { %561 = vmatpush.msrb.mxu3 %v1028_v2  ;;  %95 = vst.msk [vmem:[#allocation2 + $0x7] sm:$0x1] %vm66_vm1, %v94_v16  ;;  %428 = vmatpush.msrb.mxu1 %v1043_v5 }
  0x1d   :  { %361 = vmatpush.msrb.mxu0 %v1043_v5  ;;  %495 = vmatpush.msrb.mxu2 %v1043_v5 }
  0x1e   :  { %562 = vmatpush.msrb.mxu3 %v1043_v5 }
  0x23   :  { %v96_v17 = vld [vmem:[#allocation2] sm:$0xff] }
  0x24   :  { %v97_v18 = vmax.f32 %v96_v17, 0.0 }
  0x26   :  { %771 = vmatmul.msk.f32.vlgmr.msra.gmra.mxu0 %vm106_vm0, %v97_v18 }
  0x27   :  { %626 = vmatpush.msra.mxu0 %v1014_v0 }
  0x29   :  { %627 = vmatpush.msra.mxu0 %v1019_v1 }
  0x2b   :  { %628 = vmatpush.msra.mxu0 %v1028_v2 }
  0x2d   :  { %629 = vmatpush.msra.mxu0 %v1043_v5 }
  0x92   :  { %v158_v20 = vpop.f32.mrf.mxu1 }
  0x93   :  { %v159_v21 = vadd.f32 %v158_v20, %v1136_v19 }
  0x95   :  { %182 = vrot.lane.b32.xlu0 %v159_v21, %s945_s0 }
  0xa3   :  { %v127_v23 = vpop.f32.mrf.mxu0 }
  0xa4   :  { %v128_v24 = vadd.f32 %v797_v22, %v127_v23 }
  0xa6   :  { %130 = vst [vmem:[#allocation3] sm:$0xff] %v128_v24 }
  0xad   :  { %v137_v25 = vld [vmem:[#allocation3] sm:$0x1]  ;;  %v209_v55 = vld [vmem:[#allocation3 + $0x1] sm:$0x1]  ;;  %v276_v20 = vld [vmem:[#allocation3 + $0x2] sm:$0x1] }
  0xae   :  { %v161_v26 = vadd.f32 %v159_v21, %v137_v25 }
  0xb0   :  { %v773_v27 = vmul.f32 -1.442695, %v161_v26 }
  0xb2   :  { %799 = vpow2.f32 %v773_v27 }
  0xb8   :  { %v800_v28 = vpop.eup %799 }
  0xb9   :  { %v165_v29 = vadd.f32 1.0, %v800_v28 }
  0xbb   :  { %801 = vrcp.f32 %v165_v29  ;;  %v177_v35 = vand.u32 2147483648, %v165_v29  ;;  %vm171_vm3 = vweird.f32 %v165_v29  ;;  %v175_v36 = vand.u32 2147483647, %v165_v29 }
  0xbd   :  { %v178_v38 = vor.u32 1.1754944e-38, %v177_v35  ;;  %vm176_vm5 = vcmp.eq.f32.partialorder %v175_v36, 8.507059e+37 }
  0xc1   :  { %v802_v30 = vpop.eup %801 }
  0xc2   :  { %v167_v31 = vmul.f32 %v802_v30, %v165_v29  ;;  %vm172_vm2 = vweird.f32 %v802_v30 }
  0xc3   :  { %vm173_vm4 = vmor %vm171_vm3, %vm172_vm2 }
  0xc4   :  { %v168_v32 = vsub.f32 1.0, %v167_v31 }
  0xc6   :  { %v169_v33 = vmul.f32 %v802_v30, %v168_v32 }
  0xc8   :  { %v170_v34 = vadd.f32 %v802_v30, %v169_v33 }
  0xca   :  { %v174_v37 = vsel %vm173_vm4, %v802_v30, %v170_v34 }
  0xcb   :  { %v179_v40 = vsel %vm176_vm5, %v178_v38, %v174_v37 }
  0xcc   :  { %v192_v47 = vsub.f32 1.0, %v179_v40 }
 0x107   :  { %v183_v39 = vpop.permute.xlu0 %182 }
 0x108   :  { %v185_v41 = vmul.f32 %v183_v39, %v179_v40 }
 0x10a   :  { %187 = vrot.lane.b32.xlu0 %v185_v41, %s945_s0 }
 0x17c   :  { %v188_v42 = vpop.permute.xlu0 %187 }
 0x17d   :  { %v190_v43 = vadd.f32 %v188_v42, %v137_v25 }
 0x17f   :  { %803 = vtanh.f32 %v190_v43 }
 0x185   :  { %v804_v44 = vpop.eup %803 }
 0x186   :  { %194 = vrot.lane.b32.xlu1 %v804_v44, %s946_s5 }
 0x18e   :  { %199 = vrot.lane.b32.xlu1 %v796_v45, %s947_s6 }
 0x1f8   :  { %v195_v46 = vpop.permute.xlu1 %194 }
 0x1f9   :  { %v197_v49 = vmul.f32 %v195_v46, %v192_v47 }
 0x200   :  { %v200_v48 = vpop.permute.xlu1 %199 }
 0x201   :  { %v202_v50 = vmul.f32 %v200_v48, %v179_v40  ;;  %v343_v48 = vld [vmem:[#allocation3 + $0x3] sm:$0x1] }
 0x203   :  { %v203_v51 = vadd.f32 %v202_v50, %v197_v49 }
 0x205   :  { %205 = vrot.lane.b32.xlu2 %v203_v51, %s946_s5 }
 0x25f   :  { %v206_v52 = vpop.permute.xlu2 %205 }
 0x260   :  { %208 = vst.msk [vmem:[#allocation4] sm:$0x1] %vm66_vm1, %v206_v52  ;;  %774 = vmatmul.msk.f32.vlgmr.msra.gmra.mxu2 %vm106_vm0, %v206_v52 }
 0x2e3   :  { %v229_v53 = vpop.f32.mrf.mxu2 }
 0x2e4   :  { %v230_v54 = vadd.f32 %v229_v53, %v1136_v19 }
 0x2e6   :  { %253 = vrot.lane.b32.xlu2 %v230_v54, %s945_s0  ;;  %v232_v56 = vadd.f32 %v230_v54, %v209_v55 }
 0x2e8   :  { %v775_v57 = vmul.f32 -1.442695, %v232_v56 }
 0x2ea   :  { %805 = vpow2.f32 %v775_v57 }
 0x2f0   :  { %v806_v58 = vpop.eup %805 }
 0x2f1   :  { %v236_v59 = vadd.f32 1.0, %v806_v58 }
 0x2f3   :  { %807 = vrcp.f32 %v236_v59  ;;  %v248_v1 = vand.u32 2147483648, %v236_v59  ;;  %vm242_vm7 = vweird.f32 %v236_v59  ;;  %v246_v2 = vand.u32 2147483647, %v236_v59 }
 0x2f5   :  { %v249_v4 = vor.u32 1.1754944e-38, %v248_v1  ;;  %vm247_vm9 = vcmp.eq.f32.partialorder %v246_v2, 8.507059e+37 }
 0x2f9   :  { %v808_v60 = vpop.eup %807 }
 0x2fa   :  { %v238_v61 = vmul.f32 %v808_v60, %v236_v59  ;;  %vm243_vm6 = vweird.f32 %v808_v60 }
 0x2fb   :  { %vm244_vm8 = vmor %vm242_vm7, %vm243_vm6 }
 0x2fc   :  { %v239_v62 = vsub.f32 1.0, %v238_v61 }
 0x2fe   :  { %v240_v63 = vmul.f32 %v808_v60, %v239_v62 }
 0x300   :  { %v241_v0 = vadd.f32 %v808_v60, %v240_v63 }
 0x302   :  { %v245_v3 = vsel %vm244_vm8, %v808_v60, %v241_v0 }
 0x303   :  { %v250_v6 = vsel %vm247_vm9, %v249_v4, %v245_v3 }
 0x304   :  { %v263_v11 = vsub.f32 1.0, %v250_v6  ;;  %v269_v13 = vmul.f32 %v250_v6, %v203_v51 }
 0x340   :  { %v254_v5 = vpop.permute.xlu2 %253 }
 0x341   :  { %v256_v7 = vmul.f32 %v254_v5, %v250_v6 }
 0x343   :  { %258 = vrot.lane.b32.xlu0 %v256_v7, %s945_s0 }
 0x3b5   :  { %v259_v8 = vpop.permute.xlu0 %258 }
 0x3b6   :  { %v261_v9 = vadd.f32 %v259_v8, %v209_v55 }
 0x3b8   :  { %809 = vtanh.f32 %v261_v9 }
 0x3be   :  { %v810_v10 = vpop.eup %809 }
 0x3bf   :  { %265 = vrot.lane.b32.xlu1 %v810_v10, %s946_s5 }
 0x431   :  { %v266_v12 = vpop.permute.xlu1 %265 }
 0x432   :  { %v268_v14 = vmul.f32 %v266_v12, %v263_v11  ;;  %v410_v12 = vld [vmem:[#allocation3 + $0x4] sm:$0x1] }
 0x434   :  { %v270_v15 = vadd.f32 %v269_v13, %v268_v14 }
 0x436   :  { %272 = vrot.lane.b32.xlu2 %v270_v15, %s946_s5 }
 0x490   :  { %v273_v16 = vpop.permute.xlu2 %272 }
 0x491   :  { %275 = vst.msk [vmem:[#allocation4 + $0x1] sm:$0x1] %vm66_vm1, %v273_v16  ;;  %776 = vmatmul.msk.f32.vlgmr.msra.gmra.mxu3 %vm106_vm0, %v273_v16 }
 0x514   :  { %v296_v17 = vpop.f32.mrf.mxu3 }
 0x515   :  { %v297_v18 = vadd.f32 %v296_v17, %v1136_v19 }
 0x517   :  { %320 = vrot.lane.b32.xlu0 %v297_v18, %s945_s0  ;;  %v299_v21 = vadd.f32 %v297_v18, %v276_v20 }
 0x519   :  { %v777_v22 = vmul.f32 -1.442695, %v299_v21 }
 0x51b   :  { %811 = vpow2.f32 %v777_v22 }
 0x521   :  { %v812_v23 = vpop.eup %811 }
 0x522   :  { %v303_v24 = vadd.f32 1.0, %v812_v23 }
 0x524   :  { %813 = vrcp.f32 %v303_v24  ;;  %v315_v30 = vand.u32 2147483648, %v303_v24  ;;  %vm309_vm11 = vweird.f32 %v303_v24  ;;  %v313_v31 = vand.u32 2147483647, %v303_v24 }
 0x526   :  { %v316_v33 = vor.u32 1.1754944e-38, %v315_v30  ;;  %vm314_vm13 = vcmp.eq.f32.partialorder %v313_v31, 8.507059e+37 }
 0x52a   :  { %v814_v25 = vpop.eup %813 }
 0x52b   :  { %v305_v26 = vmul.f32 %v814_v25, %v303_v24  ;;  %vm310_vm10 = vweird.f32 %v814_v25 }
 0x52c   :  { %vm311_vm12 = vmor %vm309_vm11, %vm310_vm10 }
 0x52d   :  { %v306_v27 = vsub.f32 1.0, %v305_v26 }
 0x52f   :  { %v307_v28 = vmul.f32 %v814_v25, %v306_v27 }
 0x531   :  { %v308_v29 = vadd.f32 %v814_v25, %v307_v28 }
 0x533   :  { %v312_v32 = vsel %vm311_vm12, %v814_v25, %v308_v29 }
 0x534   :  { %v317_v35 = vsel %vm314_vm13, %v316_v33, %v312_v32 }
 0x535   :  { %v330_v40 = vsub.f32 1.0, %v317_v35  ;;  %v336_v42 = vmul.f32 %v317_v35, %v270_v15 }
 0x589   :  { %v321_v34 = vpop.permute.xlu0 %320 }
 0x58a   :  { %v323_v36 = vmul.f32 %v321_v34, %v317_v35 }
 0x58c   :  { %325 = vrot.lane.b32.xlu1 %v323_v36, %s945_s0 }
 0x5fe   :  { %v326_v37 = vpop.permute.xlu1 %325 }
 0x5ff   :  { %v328_v38 = vadd.f32 %v326_v37, %v276_v20 }
 0x601   :  { %815 = vtanh.f32 %v328_v38 }
 0x607   :  { %v816_v39 = vpop.eup %815 }
 0x608   :  { %332 = vrot.lane.b32.xlu2 %v816_v39, %s946_s5 }
 0x662   :  { %v333_v41 = vpop.permute.xlu2 %332 }
 0x663   :  { %v335_v43 = vmul.f32 %v333_v41, %v330_v40  ;;  %v477_v41 = vld [vmem:[#allocation3 + $0x5] sm:$0x1] }
 0x665   :  { %v337_v44 = vadd.f32 %v336_v42, %v335_v43 }
 0x667   :  { %339 = vrot.lane.b32.xlu0 %v337_v44, %s946_s5 }
 0x6d9   :  { %v340_v45 = vpop.permute.xlu0 %339 }
 0x6da   :  { %342 = vst.msk [vmem:[#allocation4 + $0x2] sm:$0x1] %vm66_vm1, %v340_v45  ;;  %778 = vmatmul.msk.f32.vlgmr.msrb.gmra.mxu0 %vm106_vm0, %v340_v45 }
 0x757   :  { %v363_v46 = vpop.f32.mrf.mxu0 }
 0x758   :  { %v364_v47 = vadd.f32 %v363_v46, %v1136_v19 }
 0x75a   :  { %387 = vrot.lane.b32.xlu1 %v364_v47, %s945_s0  ;;  %v366_v49 = vadd.f32 %v364_v47, %v343_v48 }
 0x75c   :  { %v779_v50 = vmul.f32 -1.442695, %v366_v49 }
 0x75e   :  { %817 = vpow2.f32 %v779_v50 }
 0x764   :  { %v818_v51 = vpop.eup %817 }
 0x765   :  { %v370_v52 = vadd.f32 1.0, %v818_v51 }
 0x767   :  { %819 = vrcp.f32 %v370_v52  ;;  %v382_v58 = vand.u32 2147483648, %v370_v52  ;;  %vm376_vm15 = vweird.f32 %v370_v52  ;;  %v380_v59 = vand.u32 2147483647, %v370_v52 }
 0x769   :  { %v383_v61 = vor.u32 1.1754944e-38, %v382_v58  ;;  %vm381_vm3 = vcmp.eq.f32.partialorder %v380_v59, 8.507059e+37 }
 0x76d   :  { %v820_v53 = vpop.eup %819 }
 0x76e   :  { %v372_v54 = vmul.f32 %v820_v53, %v370_v52  ;;  %vm377_vm14 = vweird.f32 %v820_v53 }
 0x76f   :  { %vm378_vm2 = vmor %vm376_vm15, %vm377_vm14 }
 0x770   :  { %v373_v55 = vsub.f32 1.0, %v372_v54 }
 0x772   :  { %v374_v56 = vmul.f32 %v820_v53, %v373_v55 }
 0x774   :  { %v375_v57 = vadd.f32 %v820_v53, %v374_v56 }
 0x776   :  { %v379_v60 = vsel %vm378_vm2, %v820_v53, %v375_v57 }
 0x777   :  { %v384_v63 = vsel %vm381_vm3, %v383_v61, %v379_v60 }
 0x778   :  { %v397_v4 = vsub.f32 1.0, %v384_v63  ;;  %v403_v6 = vmul.f32 %v384_v63, %v337_v44 }
 0x7cc   :  { %v388_v62 = vpop.permute.xlu1 %387 }
 0x7cd   :  { %v390_v0 = vmul.f32 %v388_v62, %v384_v63 }
 0x7cf   :  { %392 = vrot.lane.b32.xlu2 %v390_v0, %s945_s0 }
 0x829   :  { %v393_v1 = vpop.permute.xlu2 %392 }
 0x82a   :  { %v395_v2 = vadd.f32 %v393_v1, %v343_v48 }
 0x82c   :  { %821 = vtanh.f32 %v395_v2 }
 0x832   :  { %v822_v3 = vpop.eup %821 }
 0x833   :  { %399 = vrot.lane.b32.xlu0 %v822_v3, %s946_s5 }
 0x8a5   :  { %v400_v5 = vpop.permute.xlu0 %399 }
 0x8a6   :  { %v402_v7 = vmul.f32 %v400_v5, %v397_v4  ;;  %v544_v5 = vld [vmem:[#allocation3 + $0x6] sm:$0x1] }
 0x8a8   :  { %v404_v8 = vadd.f32 %v403_v6, %v402_v7 }
 0x8aa   :  { %406 = vrot.lane.b32.xlu1 %v404_v8, %s946_s5 }
 0x91c   :  { %v407_v9 = vpop.permute.xlu1 %406 }
 0x91d   :  { %409 = vst.msk [vmem:[#allocation4 + $0x3] sm:$0x1] %vm66_vm1, %v407_v9  ;;  %780 = vmatmul.msk.f32.vlgmr.msrb.gmra.mxu1 %vm106_vm0, %v407_v9 }
 0x99a   :  { %v430_v10 = vpop.f32.mrf.mxu1 }
 0x99b   :  { %v431_v11 = vadd.f32 %v430_v10, %v1136_v19 }
 0x99d   :  { %454 = vrot.lane.b32.xlu2 %v431_v11, %s945_s0  ;;  %v433_v13 = vadd.f32 %v431_v11, %v410_v12 }
 0x99f   :  { %v781_v14 = vmul.f32 -1.442695, %v433_v13 }
 0x9a1   :  { %823 = vpow2.f32 %v781_v14 }
 0x9a7   :  { %v824_v15 = vpop.eup %823 }
 0x9a8   :  { %v437_v16 = vadd.f32 1.0, %v824_v15 }
 0x9aa   :  { %825 = vrcp.f32 %v437_v16  ;;  %v449_v23 = vand.u32 2147483648, %v437_v16  ;;  %vm443_vm5 = vweird.f32 %v437_v16  ;;  %v447_v24 = vand.u32 2147483647, %v437_v16 }
 0x9ac   :  { %v450_v26 = vor.u32 1.1754944e-38, %v449_v23  ;;  %vm448_vm7 = vcmp.eq.f32.partialorder %v447_v24, 8.507059e+37 }
 0x9b0   :  { %v826_v17 = vpop.eup %825 }
 0x9b1   :  { %v439_v18 = vmul.f32 %v826_v17, %v437_v16  ;;  %vm444_vm4 = vweird.f32 %v826_v17 }
 0x9b2   :  { %vm445_vm6 = vmor %vm443_vm5, %vm444_vm4 }
 0x9b3   :  { %v440_v20 = vsub.f32 1.0, %v439_v18 }
 0x9b5   :  { %v441_v21 = vmul.f32 %v826_v17, %v440_v20 }
 0x9b7   :  { %v442_v22 = vadd.f32 %v826_v17, %v441_v21 }
 0x9b9   :  { %v446_v25 = vsel %vm445_vm6, %v826_v17, %v442_v22 }
 0x9ba   :  { %v451_v28 = vsel %vm448_vm7, %v450_v26, %v446_v25 }
 0x9bb   :  { %v464_v33 = vsub.f32 1.0, %v451_v28  ;;  %v470_v35 = vmul.f32 %v451_v28, %v404_v8 }
 0x9f7   :  { %v455_v27 = vpop.permute.xlu2 %454 }
 0x9f8   :  { %v457_v29 = vmul.f32 %v455_v27, %v451_v28 }
 0x9fa   :  { %459 = vrot.lane.b32.xlu0 %v457_v29, %s945_s0 }
 0xa6c   :  { %v460_v30 = vpop.permute.xlu0 %459 }
 0xa6d   :  { %v462_v31 = vadd.f32 %v460_v30, %v410_v12 }
 0xa6f   :  { %827 = vtanh.f32 %v462_v31 }
 0xa75   :  { %v828_v32 = vpop.eup %827 }
 0xa76   :  { %466 = vrot.lane.b32.xlu1 %v828_v32, %s946_s5 }
 0xae8   :  { %v467_v34 = vpop.permute.xlu1 %466 }
 0xae9   :  { %v469_v36 = vmul.f32 %v467_v34, %v464_v33  ;;  %v611_v34 = vld [vmem:[#allocation3 + $0x7] sm:$0x1] }
 0xaeb   :  { %v471_v37 = vadd.f32 %v470_v35, %v469_v36 }
 0xaed   :  { %473 = vrot.lane.b32.xlu2 %v471_v37, %s946_s5 }
 0xb47   :  { %v474_v38 = vpop.permute.xlu2 %473 }
 0xb48   :  { %476 = vst.msk [vmem:[#allocation4 + $0x4] sm:$0x1] %vm66_vm1, %v474_v38  ;;  %782 = vmatmul.msk.f32.vlgmr.msrb.gmra.mxu2 %vm106_vm0, %v474_v38 }
 0xbcb   :  { %v497_v39 = vpop.f32.mrf.mxu2 }
 0xbcc   :  { %v498_v40 = vadd.f32 %v497_v39, %v1136_v19 }
 0xbce   :  { %521 = vrot.lane.b32.xlu0 %v498_v40, %s945_s0  ;;  %v500_v42 = vadd.f32 %v498_v40, %v477_v41 }
 0xbd0   :  { %v783_v43 = vmul.f32 -1.442695, %v500_v42 }
 0xbd2   :  { %829 = vpow2.f32 %v783_v43 }
 0xbd8   :  { %v830_v44 = vpop.eup %829 }
 0xbd9   :  { %v504_v45 = vadd.f32 1.0, %v830_v44 }
 0xbdb   :  { %831 = vrcp.f32 %v504_v45  ;;  %v516_v51 = vand.u32 2147483648, %v504_v45  ;;  %vm510_vm9 = vweird.f32 %v504_v45  ;;  %v514_v52 = vand.u32 2147483647, %v504_v45 }
 0xbdd   :  { %v517_v54 = vor.u32 1.1754944e-38, %v516_v51  ;;  %vm515_vm11 = vcmp.eq.f32.partialorder %v514_v52, 8.507059e+37 }
 0xbe1   :  { %v832_v46 = vpop.eup %831 }
 0xbe2   :  { %v506_v47 = vmul.f32 %v832_v46, %v504_v45  ;;  %vm511_vm8 = vweird.f32 %v832_v46 }
 0xbe3   :  { %vm512_vm10 = vmor %vm510_vm9, %vm511_vm8 }
 0xbe4   :  { %v507_v48 = vsub.f32 1.0, %v506_v47 }
 0xbe6   :  { %v508_v49 = vmul.f32 %v832_v46, %v507_v48 }
 0xbe8   :  { %v509_v50 = vadd.f32 %v832_v46, %v508_v49 }
 0xbea   :  { %v513_v53 = vsel %vm512_vm10, %v832_v46, %v509_v50 }
 0xbeb   :  { %v518_v56 = vsel %vm515_vm11, %v517_v54, %v513_v53 }
 0xbec   :  { %v531_v61 = vsub.f32 1.0, %v518_v56  ;;  %v537_v63 = vmul.f32 %v518_v56, %v471_v37 }
 0xc40   :  { %v522_v55 = vpop.permute.xlu0 %521 }
 0xc41   :  { %v524_v57 = vmul.f32 %v522_v55, %v518_v56 }
 0xc43   :  { %526 = vrot.lane.b32.xlu1 %v524_v57, %s945_s0 }
 0xcb5   :  { %v527_v58 = vpop.permute.xlu1 %526 }
 0xcb6   :  { %v529_v59 = vadd.f32 %v527_v58, %v477_v41  ;;  %v683_v58 = vld [vmem:[%s1226_s7 + $0x18] sm:$0xff] }
 0xcb7   :  { %703 = vmatpush.msra.mxu1 %v683_v58 }
 0xcb8   :  { %833 = vtanh.f32 %v529_v59  ;;  %v682_v59 = vld [vmem:[%s1226_s7 + $0x10] sm:$0xff] }
 0xcb9   :  { %704 = vmatpush.msra.mxu1 %v682_v59 }
 0xcbe   :  { %v834_v60 = vpop.eup %833 }
 0xcbf   :  { %533 = vrot.lane.b32.xlu2 %v834_v60, %s946_s5  ;;  %v681_v60 = vld [vmem:[%s1226_s7 + $0x8] sm:$0xff] }
 0xcc0   :  { %705 = vmatpush.msra.mxu1 %v681_v60 }
 0xd19   :  { %v534_v62 = vpop.permute.xlu2 %533 }
 0xd1a   :  { %v536_v0 = vmul.f32 %v534_v62, %v531_v61  ;;  %v680_v61 = vld [vmem:[%s1226_s7] sm:$0xff]  ;;  %s948_s7 = smov [#allocation11]  }
 0xd1b   :  { %706 = vmatpush.msra.mxu1 %v680_v61  ;;  %s738_s14 = sshll.u32 %s948_s7, 4  ;;  %s739_s14 = int_to_ptr.vmem [resolvable:$true] %s738_s14 }
 0xd1c   :  { %v538_v1 = vadd.f32 %v537_v63, %v536_v0  ;;  %v798_v0 = vld [vmem:[%s1227_s8] ss:$0 sm:$0xff]  ;;  %s949_s8 = smov [#allocation10]  }
 0xd1d   :  { %s727_s18 = sshll.u32 %s949_s8, 4  ;;  %s728_s18 = int_to_ptr.vmem [resolvable:$true] %s727_s18 }
 0xd1e   :  { %540 = vrot.lane.b32.xlu0 %v538_v1, %s946_s5 }
 0xd90   :  { %v541_v2 = vpop.permute.xlu0 %540 }
 0xd91   :  { %543 = vst.msk [vmem:[#allocation4 + $0x5] sm:$0x1] %vm66_vm1, %v541_v2  ;;  %784 = vmatmul.msk.f32.vlgmr.msrb.gmra.mxu3 %vm106_vm0, %v541_v2 }
 0xe14   :  { %v564_v3 = vpop.f32.mrf.mxu3 }
 0xe15   :  { %v565_v4 = vadd.f32 %v564_v3, %v1136_v19 }
 0xe17   :  { %588 = vrot.lane.b32.xlu1 %v565_v4, %s945_s0  ;;  %v567_v6 = vadd.f32 %v565_v4, %v544_v5 }
 0xe19   :  { %v785_v7 = vmul.f32 -1.442695, %v567_v6 }
 0xe1b   :  { %835 = vpow2.f32 %v785_v7 }
 0xe21   :  { %v836_v8 = vpop.eup %835 }
 0xe22   :  { %v571_v9 = vadd.f32 1.0, %v836_v8 }
 0xe24   :  { %837 = vrcp.f32 %v571_v9  ;;  %v583_v15 = vand.u32 2147483648, %v571_v9  ;;  %vm577_vm13 = vweird.f32 %v571_v9  ;;  %v581_v16 = vand.u32 2147483647, %v571_v9 }
 0xe26   :  { %v584_v18 = vor.u32 1.1754944e-38, %v583_v15  ;;  %vm582_vm15 = vcmp.eq.f32.partialorder %v581_v16, 8.507059e+37 }
 0xe2a   :  { %v838_v10 = vpop.eup %837 }
 0xe2b   :  { %v573_v11 = vmul.f32 %v838_v10, %v571_v9  ;;  %vm578_vm12 = vweird.f32 %v838_v10 }
 0xe2c   :  { %vm579_vm14 = vmor %vm577_vm13, %vm578_vm12 }
 0xe2d   :  { %v574_v12 = vsub.f32 1.0, %v573_v11 }
 0xe2f   :  { %v575_v13 = vmul.f32 %v838_v10, %v574_v12 }
 0xe31   :  { %v576_v14 = vadd.f32 %v838_v10, %v575_v13 }
 0xe33   :  { %v580_v17 = vsel %vm579_vm14, %v838_v10, %v576_v14 }
 0xe34   :  { %v585_v21 = vsel %vm582_vm15, %v584_v18, %v580_v17 }
 0xe35   :  { %v598_v26 = vsub.f32 1.0, %v585_v21  ;;  %v604_v28 = vmul.f32 %v585_v21, %v538_v1 }
 0xe89   :  { %v589_v20 = vpop.permute.xlu1 %588 }
 0xe8a   :  { %v591_v22 = vmul.f32 %v589_v20, %v585_v21 }
 0xe8c   :  { %593 = vrot.lane.b32.xlu2 %v591_v22, %s945_s0 }
 0xee6   :  { %v594_v23 = vpop.permute.xlu2 %593 }
 0xee7   :  { %v596_v24 = vadd.f32 %v594_v23, %v544_v5 }
 0xee9   :  { %839 = vtanh.f32 %v596_v24 }
 0xeef   :  { %v840_v25 = vpop.eup %839 }
 0xef0   :  { %600 = vrot.lane.b32.xlu0 %v840_v25, %s946_s5 }
 0xf62   :  { %v601_v27 = vpop.permute.xlu0 %600 }
 0xf63   :  { %v603_v29 = vmul.f32 %v601_v27, %v598_v26 }
 0xf65   :  { %v605_v30 = vadd.f32 %v604_v28, %v603_v29 }
 0xf67   :  { %607 = vrot.lane.b32.xlu1 %v605_v30, %s946_s5 }
 0xfd9   :  { %v608_v31 = vpop.permute.xlu1 %607 }
 0xfda   :  { %610 = vst.msk [vmem:[#allocation4 + $0x6] sm:$0x1] %vm66_vm1, %v608_v31  ;;  %786 = vmatmul.msk.f32.vlgmr.msra.gmra.mxu0 %vm106_vm0, %v608_v31 }
0x1057   :  { %v631_v32 = vpop.f32.mrf.mxu0 }
0x1058   :  { %v632_v33 = vadd.f32 %v631_v32, %v1136_v19 }
0x105a   :  { %655 = vrot.lane.b32.xlu2 %v632_v33, %s945_s0  ;;  %v634_v35 = vadd.f32 %v632_v33, %v611_v34 }
0x105c   :  { %v787_v36 = vmul.f32 -1.442695, %v634_v35 }
0x105e   :  { %841 = vpow2.f32 %v787_v36 }
0x1064   :  { %v842_v37 = vpop.eup %841 }
0x1065   :  { %v638_v38 = vadd.f32 1.0, %v842_v37 }
0x1067   :  { %843 = vrcp.f32 %v638_v38  ;;  %v650_v44 = vand.u32 2147483648, %v638_v38  ;;  %vm644_vm3 = vweird.f32 %v638_v38  ;;  %v648_v45 = vand.u32 2147483647, %v638_v38 }
0x1069   :  { %v651_v46 = vor.u32 1.1754944e-38, %v650_v44  ;;  %vm649_vm5 = vcmp.eq.f32.partialorder %v648_v45, 8.507059e+37 }
0x106d   :  { %v844_v39 = vpop.eup %843 }
0x106e   :  { %v640_v40 = vmul.f32 %v844_v39, %v638_v38  ;;  %vm645_vm2 = vweird.f32 %v844_v39 }
0x106f   :  { %vm646_vm4 = vmor %vm644_vm3, %vm645_vm2 }
0x1070   :  { %v641_v41 = vsub.f32 1.0, %v640_v40 }
0x1072   :  { %v642_v42 = vmul.f32 %v844_v39, %v641_v41 }
0x1074   :  { %v643_v43 = vadd.f32 %v844_v39, %v642_v42 }
0x1076   :  { %v647_v19 = vsel %vm646_vm4, %v844_v39, %v643_v43 }
0x1077   :  { %v652_v48 = vsel %vm649_vm5, %v651_v46, %v647_v19 }
0x1078   :  { %v665_v53 = vsub.f32 1.0, %v652_v48  ;;  %v671_v55 = vmul.f32 %v652_v48, %v605_v30 }
0x10b4   :  { %v656_v47 = vpop.permute.xlu2 %655 }
0x10b5   :  { %v658_v49 = vmul.f32 %v656_v47, %v652_v48 }
0x10b7   :  { %660 = vrot.lane.b32.xlu0 %v658_v49, %s945_s0 }
0x1129   :  { %v661_v50 = vpop.permute.xlu0 %660 }
0x112a   :  { %v663_v51 = vadd.f32 %v661_v50, %v611_v34 }
0x112c   :  { %845 = vtanh.f32 %v663_v51 }
0x1132   :  { %v846_v52 = vpop.eup %845 }
0x1133   :  { %667 = vrot.lane.b32.xlu1 %v846_v52, %s946_s5 }
0x11a5   :  { %v668_v54 = vpop.permute.xlu1 %667 }
0x11a6   :  { %v670_v56 = vmul.f32 %v668_v54, %v665_v53 }
0x11a8   :  { %v672_v57 = vadd.f32 %v671_v55, %v670_v56 }
0x11aa   :  { %674 = vrot.lane.b32.xlu2 %v672_v57, %s946_s5 }
0x1204   :  { %v675_v62 = vpop.permute.xlu2 %674 }
0x1205   :  { %677 = vst.msk [vmem:[#allocation4 + $0x7] sm:$0x1] %vm66_vm1, %v675_v62 }
0x1206   :  { %678 = vst.msk [vmem:[#allocation11] sm:$0x1] %vm66_vm1, %v675_v62 }
0x1207   :  { %743 = dma.vmem_to_hbm [thread:$0]  %s739_s14, 16, %s741_s17, [#allocation12]  }
0x120c   :  { %v679_v63 = vld [vmem:[#allocation4] sm:$0xff] }
0x120d   :  { %788 = vmatmul.msk.f32.vlgmr.msra.gmra.mxu1 %vm106_vm0, %v679_v63 }
0x128a   :  { %v708_v1 = vpop.f32.mrf.mxu1 }
0x128b   :  { %v709_v2 = vadd.f32 %v798_v0, %v708_v1 }
0x128d   :  { %711 = vmax.xlane.f32.xlu0 %v709_v2 }
0x1300   :  { %v712_v3 = vpop.xlane.xlu0 %711 }
0x1301   :  { %v713_v4 = vsub.f32 %v709_v2, %v712_v3 }
0x1303   :  { %v714_v5 = vmul.f32 1.442695, %v713_v4 }
0x1305   :  { %847 = vpow2.f32 %v714_v5 }
0x130b   :  { %v848_v6 = vpop.eup %847 }
0x130c   :  { %716 = vadd.xlane.f32.xlu1 %v848_v6 }
0x137f   :  { %v717_v7 = vpop.xlane.xlu1 %716 }
0x1380   :  { %849 = vlog2.f32 %v717_v7 }
0x1386   :  { %v850_v8 = vpop.eup %849 }
0x1387   :  { %v719_v9 = vmul.f32 0.6931472, %v850_v8 }
0x1389   :  { %v720_v10 = vsub.f32 %v713_v4, %v719_v9 }
0x138b   :  { %721 = vst [vmem:[#allocation10] sm:$0xff] %v720_v10 }
0x138c   :  { %732 = dma.vmem_to_hbm [thread:$0]  %s728_s18, 128, %s730_s20, [#allocation7]  }
0x138d   :  { %939 = dma.done.wait [#allocation7], 128  }
0x138e   :  { %940 = vsyncadd [#allocation7], 4294967168 }
0x138f   :  { %941 = dma.done.wait [#allocation12], 16  }
0x1390   :  { %942 = vsyncadd [#allocation12], 4294967280 }
0x1391   :  { %752 = vsyncpa [#allocation6], 1 }
0x1392   :  { %753 = vsyncpa [#allocation7], 1 }
0x1393   :  { %754 = vsyncpa [#allocation12], 1 }
0x1394   :  { %755 = vsyncpa [#allocation8], 1 }

</bundles_post_ra>
